<compile_context>
chip_gen: v7x
topology: tpu7x:2x2x1
jax: 0.10.0
libtpu: 0.0.40
codegen_flags: <defaults>
</compile_context>

<pallas_src>
import functools

import jax
import jax.numpy as jnp
from jax.experimental import pallas as pl
from jax.experimental.pallas import tpu as pltpu


def _round_up(x, m):
    return (x + m - 1) // m * m


def _gelu_exact(x):
    # PyTorch F.gelu default: 0.5 * x * (1 + erf(x / sqrt(2)))
    return 0.5 * x * (1.0 + jax.lax.erf(x * 0.7071067811865476))


def _chip_budget():
    """Per-generation tile caps / VMEM limit (conservative fallback)."""
    try:
        kind = jax.devices()[0].device_kind.lower()
    except Exception:  # pragma: no cover - no backend
        kind = ""
    if "v7" in kind or "7x" in kind:
        # 64 MiB physical VMEM, 2 TensorCores share HBM.
        return dict(tn_cap=1024, tv_cap=1024, vmem_bytes=48 << 20, cores=2)
    if "v6" in kind:
        return dict(tn_cap=1024, tv_cap=2048, vmem_bytes=100 << 20, cores=1)
    if "v5" in kind:
        return dict(tn_cap=512, tv_cap=2048, vmem_bytes=100 << 20, cores=1)
    # Unknown chip (or CPU interpret): stay inside a default-ish scoped limit.
    return dict(tn_cap=256, tv_cap=1024, vmem_bytes=None, cores=1)


def _vmem_estimate(tn, tv, H, out_bytes):
    """Rough resident-set estimate (double-buffered blocks + scratch)."""
    x = 2 * tn * H * 2              # bf16 token tile
    w1 = 2 * H * H * 2              # bf16 dense weight (constant block)
    small = 2 * (3 * H + tv) * 4    # biases / LN params (f32)
    w2 = 2 * H * tv * 2             # bf16 decoder-weight tile
    out = 2 * tn * tv * out_bytes   # logits tile
    h = tn * H * 2                  # bf16 hidden scratch (single)
    return x + w1 + small + w2 + out + h


def _lm_head_kernel(x_ref, w1_ref, b1_ref, gamma_ref, beta_ref,
                    w2_ref, b2_ref, o_ref, h_ref, *, eps):
    """Fused dense -> gelu -> LayerNorm -> decoder projection.

    Grid = (token_tiles, vocab_tiles); vocab innermost ("arbitrary").
    The post-LayerNorm hidden for the current token tile lives in the VMEM
    scratch `h_ref` and is recomputed only when the vocab index is 0.
    """
    j = pl.program_id(1)

    @pl.when(j == 0)
    def _():
        # dense (bf16 MXU inputs, f32 accumulate); x arrives already in bf16.
        h = jnp.dot(x_ref[...], w1_ref[...], preferred_element_type=jnp.float32)
        h = h + b1_ref[...].astype(jnp.float32)
        # gelu (exact erf) + LayerNorm in f32 on the VPU/EUP.
        h = _gelu_exact(h)
        mean = jnp.mean(h, axis=-1, keepdims=True)
        cen = h - mean
        var = jnp.mean(cen * cen, axis=-1, keepdims=True)
        inv = jax.lax.rsqrt(var + eps)
        y = cen * inv * gamma_ref[...].astype(jnp.float32) \
            + beta_ref[...].astype(jnp.float32)
        # bf16 is exactly the precision the decoder MXU sees anyway; storing
        # bf16 halves the resident hidden with no extra rounding vs f32+cast.
        h_ref[...] = y.astype(jnp.bfloat16)

    # decoder: (tn, H) @ (H, tv) in bf16, f32 accumulate, + bias tile.
    logits = jnp.dot(h_ref[...], w2_ref[...], preferred_element_type=jnp.float32)
    o_ref[...] = (logits + b2_ref[...].astype(jnp.float32)).astype(o_ref.dtype)


@functools.partial(jax.jit, static_argnames=("eps", "out_dtype"))
def roberta_lm_head(features, w_dense, b_dense, ln_gamma, ln_beta,
                    w_dec, b_dec, eps=1e-5, out_dtype=jnp.float32):
    """features: [B, S, H].  Returns logits [B, S, V] in `out_dtype`.

    out_dtype=jnp.bfloat16 halves logit-writeback HBM bytes (recommended on
    v6e, where f32 writeback is the binding wall); default f32 matches the
    PyTorch module exactly.
    """
    B, S, H = features.shape
    V = w_dec.shape[1]
    N = B * S

    cfg = _chip_budget()
    out_bytes = jnp.dtype(out_dtype).itemsize

    # --- tile sizes: big token tile (sets decoder-GEMM arithmetic intensity,
    # i.e. how often w2 is re-streamed from HBM), lane-aligned vocab tile.
    tn = min(cfg["tn_cap"], _round_up(N, 8))
    tv = min(cfg["tv_cap"], _round_up(V, 128))

    # v7x: 2 TensorCores share HBM - make sure the "parallel" token axis has
    # at least 2 tiles so both cores get work (zero extra w2 traffic).
    if cfg["cores"] >= 2 and _round_up(N, tn) // tn < 2 and N > 8:
        tn = min(tn, _round_up((N + 1) // 2, 8))

    # Fit the working set into the generation-specific VMEM budget.  Shrink tv
    # first (only DMA granularity), keep tn (the intensity lever) if possible.
    budget = int(0.9 * (cfg["vmem_bytes"] if cfg["vmem_bytes"] else (16 << 20)))
    while _vmem_estimate(tn, tv, H, out_bytes) > budget and tv > 128:
        tv //= 2
    while _vmem_estimate(tn, tv, H, out_bytes) > budget and tn > 8:
        tn = max(8, tn // 2)

    n_pad = _round_up(N, tn)
    v_pad = _round_up(V, tv)

    # x goes to the kernel in bf16 (it is only ever consumed as bf16 MXU
    # input) - halves its HBM stream and its idle double-buffered VMEM block.
    x2d = features.reshape(N, H).astype(jnp.bfloat16)
    if n_pad != N:
        x2d = jnp.pad(x2d, ((0, n_pad - N), (0, 0)))

    # bf16 weights for the MXU path; biases / LN params stay f32.
    w1 = w_dense.astype(jnp.bfloat16)
    w2 = w_dec.astype(jnp.bfloat16)
    b2 = b_dec.astype(jnp.float32)
    if v_pad != V:
        w2 = jnp.pad(w2, ((0, 0), (0, v_pad - V)))
        b2 = jnp.pad(b2, ((0, v_pad - V),))

    kernel = functools.partial(_lm_head_kernel, eps=float(eps))

    cp_kwargs = dict(dimension_semantics=("parallel", "arbitrary"))
    if cfg["vmem_bytes"] is not None:
        cp_kwargs["vmem_limit_bytes"] = int(cfg["vmem_bytes"])

    logits = pl.pallas_call(
        kernel,
        out_shape=jax.ShapeDtypeStruct((n_pad, v_pad), out_dtype),
        grid_spec=pltpu.PrefetchScalarGridSpec(
            num_scalar_prefetch=0,
            grid=(n_pad // tn, v_pad // tv),            # vocab axis innermost
            in_specs=[
                pl.BlockSpec((tn, H), lambda i, j: (i, 0)),   # x tile (bf16)
                # w1/b1/gamma/beta are constant blocks; on v7x they could be
                # single-buffered (pipeline_mode=pl.Buffered(1)) to reclaim a
                # few MiB - negligible on v5e/v6e, so left double-buffered.
                pl.BlockSpec((H, H), lambda i, j: (0, 0)),    # dense W (bf16)
                pl.BlockSpec((1, H), lambda i, j: (0, 0)),    # dense bias
                pl.BlockSpec((1, H), lambda i, j: (0, 0)),    # LN gamma
                pl.BlockSpec((1, H), lambda i, j: (0, 0)),    # LN beta
                pl.BlockSpec((H, tv), lambda i, j: (0, j)),   # decoder W tile
                pl.BlockSpec((1, tv), lambda i, j: (0, j)),   # decoder bias tile
            ],
            out_specs=pl.BlockSpec((tn, tv), lambda i, j: (i, j)),
            scratch_shapes=[pltpu.VMEM((tn, H), jnp.bfloat16)],  # resident hidden
        ),
        compiler_params=pltpu.CompilerParams(**cp_kwargs),
    )(x2d, w1, b_dense.reshape(1, H).astype(jnp.float32),
      ln_gamma.reshape(1, H).astype(jnp.float32),
      ln_beta.reshape(1, H).astype(jnp.float32),
      w2, b2.reshape(1, v_pad))

    return logits[:N, :V].reshape(B, S, V)


def _reference(features, w_dense, b_dense, ln_gamma, ln_beta, w_dec, b_dec, eps):
    x = features @ w_dense + b_dense
    x = _gelu_exact(x)
    mean = jnp.mean(x, axis=-1, keepdims=True)
    var = jnp.mean((x - mean) ** 2, axis=-1, keepdims=True)
    x = (x - mean) * jax.lax.rsqrt(var + eps) * ln_gamma + ln_beta
    return x @ w_dec + b_dec


if __name__ == "__main__":
    # Small RoBERTa-like config: batch=2, seq=8, hidden=32, vocab=64.
    B, S, H, V = 2, 8, 32, 64
    eps = 1e-5

    key = jax.random.PRNGKey(0)
    kf, kw1, kb1, kg, kb, kw2 = jax.random.split(key, 6)

    features = jax.random.normal(kf, (B, S, H), dtype=jnp.float32)

    # Deterministic synthetic parameters (shapes match nn.Linear / LayerNorm).
    w_dense = jax.random.normal(kw1, (H, H), dtype=jnp.float32) * 0.05   # [in, out]
    b_dense = jax.random.normal(kb1, (H,), dtype=jnp.float32) * 0.02
    ln_gamma = jnp.ones((H,), dtype=jnp.float32) \
        + 0.1 * jax.random.normal(kg, (H,), dtype=jnp.float32)
    ln_beta = 0.1 * jax.random.normal(kb, (H,), dtype=jnp.float32)
    w_dec = jax.random.normal(kw2, (H, V), dtype=jnp.float32) * 0.05     # [in, out]
    b_dec = jnp.zeros((V,), dtype=jnp.float32)  # decoder.bias tied to self.bias (zeros)

    ref = _reference(features, w_dense, b_dense, ln_gamma, ln_beta, w_dec, b_dec, eps)

    # f32 logits (module-exact semantics).
    out = roberta_lm_head(features, w_dense, b_dense, ln_gamma, ln_beta,
                          w_dec, b_dec, eps=eps)
    out = jax.block_until_ready(out)
    assert out.shape == (B, S, V), out.shape
    # bf16 MXU path vs f32 reference -> looser tolerance than pure-f32.
    assert jnp.allclose(out, ref, atol=2e-2, rtol=2e-2), "mismatch vs reference (f32 out)"

    # bf16 logits variant (halves writeback bytes; recommended on v6e).
    out_bf16 = roberta_lm_head(features, w_dense, b_dense, ln_gamma, ln_beta,
                               w_dec, b_dec, eps=eps, out_dtype=jnp.bfloat16)
    out_bf16 = jax.block_until_ready(out_bf16)
    assert out_bf16.dtype == jnp.bfloat16
    assert jnp.allclose(out_bf16.astype(jnp.float32), ref, atol=6e-2, rtol=6e-2), \
        "mismatch vs reference (bf16 out)"

    print("KERNEL_OK")
</pallas_src>

<mosaic_0001>
module attributes {stable_mosaic.version = 11 : i64} {
  func.func @_lm_head_kernel(%arg0: i32, %arg1: i32, %arg2: memref<16x32xbf16, #tpu.memory_space<vmem>>, %arg3: memref<32x32xbf16, #tpu.memory_space<vmem>>, %arg4: memref<1x32xf32, #tpu.memory_space<vmem>>, %arg5: memref<1x32xf32, #tpu.memory_space<vmem>>, %arg6: memref<1x32xf32, #tpu.memory_space<vmem>>, %arg7: memref<32x128xbf16, #tpu.memory_space<vmem>>, %arg8: memref<1x128xf32, #tpu.memory_space<vmem>>, %arg9: memref<16x128xf32, #tpu.memory_space<vmem>>, %arg10: memref<16x32xbf16, #tpu.memory_space<vmem>>) attributes {dimension_semantics = [#tpu.dimension_semantics<parallel>, #tpu.dimension_semantics<arbitrary>], iteration_bounds = array<i64: 1, 1>, scalar_prefetch = 0 : i64, scratch_operands = 1 : i64, tpu.core_type = #tpu.core_type<tc>, window_params = [{transform_indices = @transform_0, window_bounds = array<i64: 16, 32>}, {pipeline_mode = #tpu.pipeline_mode<synchronous>, transform_indices = @transform_1, window_bounds = array<i64: 32, 32>}, {pipeline_mode = #tpu.pipeline_mode<synchronous>, transform_indices = @transform_2, window_bounds = array<i64: 1, 32>}, {pipeline_mode = #tpu.pipeline_mode<synchronous>, transform_indices = @transform_3, window_bounds = array<i64: 1, 32>}, {pipeline_mode = #tpu.pipeline_mode<synchronous>, transform_indices = @transform_4, window_bounds = array<i64: 1, 32>}, {transform_indices = @transform_5, window_bounds = array<i64: 32, 128>}, {transform_indices = @transform_6, window_bounds = array<i64: 1, 128>}, {transform_indices = @transform_7, window_bounds = array<i64: 16, 128>}]} {
    %c0_i32 = arith.constant 0 : i32
    %0 = arith.cmpi eq, %arg1, %c0_i32 : i32
    %1 = arith.extui %0 : i1 to i32
    %c0_i32_0 = arith.constant 0 : i32
    %2 = arith.cmpi ne, %1, %c0_i32_0 : i32
    scf.if %2 {
      %c0_8 = arith.constant 0 : index
      %c0_9 = arith.constant 0 : index
      %10 = vector.load %arg2[%c0_8, %c0_9] : memref<16x32xbf16, #tpu.memory_space<vmem>>, vector<16x32xbf16>
      %c0_10 = arith.constant 0 : index
      %c0_11 = arith.constant 0 : index
      %11 = vector.load %arg3[%c0_10, %c0_11] : memref<32x32xbf16, #tpu.memory_space<vmem>>, vector<32x32xbf16>
      %cst_12 = arith.constant dense<0.000000e+00> : vector<16x32xf32>
      %12 = tpu.matmul %10, %11, %cst_12 {dimension_numbers = #tpu.dot_dimension_numbers<[1], [0], [0], [1], [0, 0, 1, 1], [], []>} : vector<16x32xbf16>, vector<32x32xbf16>, vector<16x32xf32> -> vector<16x32xf32>
      %c0_13 = arith.constant 0 : index
      %c0_14 = arith.constant 0 : index
      %13 = vector.load %arg4[%c0_13, %c0_14] : memref<1x32xf32, #tpu.memory_space<vmem>>, vector<1x32xf32>
      %14 = vector.broadcast %13 : vector<1x32xf32> to vector<16x32xf32>
      %15 = arith.addf %12, %14 : vector<16x32xf32>
      %cst_15 = arith.constant 5.000000e-01 : f32
      %16 = vector.broadcast %cst_15 : f32 to vector<16x32xf32>
      %17 = arith.mulf %16, %15 : vector<16x32xf32>
      %cst_16 = arith.constant 0.707106769 : f32
      %18 = vector.broadcast %cst_16 : f32 to vector<16x32xf32>
      %19 = arith.mulf %15, %18 : vector<16x32xf32>
      %20 = math.erf %19 : vector<16x32xf32>
      %cst_17 = arith.constant 1.000000e+00 : f32
      %21 = vector.broadcast %cst_17 : f32 to vector<16x32xf32>
      %22 = arith.addf %21, %20 : vector<16x32xf32>
      %23 = arith.mulf %17, %22 : vector<16x32xf32>
      %cst_18 = arith.constant dense<0.000000e+00> : vector<16xf32>
      %24 = vector.multi_reduction <add>, %23, %cst_18 [1] : vector<16x32xf32> to vector<16xf32>
      %25 = vector.shape_cast %24 : vector<16xf32> to vector<16x1xf32>
      %cst_19 = arith.constant 3.200000e+01 : f32
      %26 = vector.broadcast %cst_19 : f32 to vector<16x1xf32>
      %27 = arith.divf %25, %26 : vector<16x1xf32>
      %28 = vector.broadcast %27 : vector<16x1xf32> to vector<16x32xf32>
      %29 = arith.subf %23, %28 : vector<16x32xf32>
      %30 = arith.mulf %29, %29 : vector<16x32xf32>
      %cst_20 = arith.constant dense<0.000000e+00> : vector<16xf32>
      %31 = vector.multi_reduction <add>, %30, %cst_20 [1] : vector<16x32xf32> to vector<16xf32>
      %32 = vector.shape_cast %31 : vector<16xf32> to vector<16x1xf32>
      %cst_21 = arith.constant 3.200000e+01 : f32
      %33 = vector.broadcast %cst_21 : f32 to vector<16x1xf32>
      %34 = arith.divf %32, %33 : vector<16x1xf32>
      %cst_22 = arith.constant 9.99999974E-6 : f32
      %35 = vector.broadcast %cst_22 : f32 to vector<16x1xf32>
      %36 = arith.addf %34, %35 : vector<16x1xf32>
      %37 = math.rsqrt %36 : vector<16x1xf32>
      %38 = vector.broadcast %37 : vector<16x1xf32> to vector<16x32xf32>
      %39 = arith.mulf %29, %38 : vector<16x32xf32>
      %c0_23 = arith.constant 0 : index
      %c0_24 = arith.constant 0 : index
      %40 = vector.load %arg5[%c0_23, %c0_24] : memref<1x32xf32, #tpu.memory_space<vmem>>, vector<1x32xf32>
      %41 = vector.broadcast %40 : vector<1x32xf32> to vector<16x32xf32>
      %42 = arith.mulf %39, %41 : vector<16x32xf32>
      %c0_25 = arith.constant 0 : index
      %c0_26 = arith.constant 0 : index
      %43 = vector.load %arg6[%c0_25, %c0_26] : memref<1x32xf32, #tpu.memory_space<vmem>>, vector<1x32xf32>
      %44 = vector.broadcast %43 : vector<1x32xf32> to vector<16x32xf32>
      %45 = arith.addf %42, %44 : vector<16x32xf32>
      %46 = arith.truncf %45 : vector<16x32xf32> to vector<16x32xbf16>
      %c0_27 = arith.constant 0 : index
      %c0_28 = arith.constant 0 : index
      %47 = vector.load %arg10[%c0_27, %c0_28] : memref<16x32xbf16, #tpu.memory_space<vmem>>, vector<16x32xbf16>
      tpu.vector_store %arg10[%c0_27, %c0_28], %46 {strides = array<i32>} : memref<16x32xbf16, #tpu.memory_space<vmem>>, vector<16x32xbf16>,
    } else {
    }
    %c0 = arith.constant 0 : index
    %c0_1 = arith.constant 0 : index
    %3 = vector.load %arg10[%c0, %c0_1] : memref<16x32xbf16, #tpu.memory_space<vmem>>, vector<16x32xbf16>
    %c0_2 = arith.constant 0 : index
    %c0_3 = arith.constant 0 : index
    %4 = vector.load %arg7[%c0_2, %c0_3] : memref<32x128xbf16, #tpu.memory_space<vmem>>, vector<32x128xbf16>
    %cst = arith.constant dense<0.000000e+00> : vector<16x128xf32>
    %5 = tpu.matmul %3, %4, %cst {dimension_numbers = #tpu.dot_dimension_numbers<[1], [0], [0], [1], [0, 0, 1, 1], [], []>} : vector<16x32xbf16>, vector<32x128xbf16>, vector<16x128xf32> -> vector<16x128xf32>
    %c0_4 = arith.constant 0 : index
    %c0_5 = arith.constant 0 : index
    %6 = vector.load %arg8[%c0_4, %c0_5] : memref<1x128xf32, #tpu.memory_space<vmem>>, vector<1x128xf32>
    %7 = vector.broadcast %6 : vector<1x128xf32> to vector<16x128xf32>
    %8 = arith.addf %5, %7 : vector<16x128xf32>
    %c0_6 = arith.constant 0 : index
    %c0_7 = arith.constant 0 : index
    %9 = vector.load %arg9[%c0_6, %c0_7] : memref<16x128xf32, #tpu.memory_space<vmem>>, vector<16x128xf32>
    tpu.vector_store %arg9[%c0_6, %c0_7], %8 {strides = array<i32>} : memref<16x128xf32, #tpu.memory_space<vmem>>, vector<16x128xf32>,
    return
  }
  func.func @transform_0(%arg0: i32, %arg1: i32) -> (i32, i32) {
    %c0_i32 = arith.constant 0 : i32
    %c0_i32_0 = arith.constant 0 : i32
    return %arg0, %c0_i32 : i32, i32
  }
  func.func @transform_1(%arg0: i32, %arg1: i32) -> (i32, i32) {
    %c0_i32 = arith.constant 0 : i32
    %c0_i32_0 = arith.constant 0 : i32
    %c0_i32_1 = arith.constant 0 : i32
    return %c0_i32, %c0_i32_0 : i32, i32
  }
  func.func @transform_2(%arg0: i32, %arg1: i32) -> (i32, i32) {
    %c0_i32 = arith.constant 0 : i32
    %c0_i32_0 = arith.constant 0 : i32
    %c0_i32_1 = arith.constant 0 : i32
    return %c0_i32, %c0_i32_0 : i32, i32
  }
  func.func @transform_3(%arg0: i32, %arg1: i32) -> (i32, i32) {
    %c0_i32 = arith.constant 0 : i32
    %c0_i32_0 = arith.constant 0 : i32
    %c0_i32_1 = arith.constant 0 : i32
    return %c0_i32, %c0_i32_0 : i32, i32
  }
  func.func @transform_4(%arg0: i32, %arg1: i32) -> (i32, i32) {
    %c0_i32 = arith.constant 0 : i32
    %c0_i32_0 = arith.constant 0 : i32
    %c0_i32_1 = arith.constant 0 : i32
    return %c0_i32, %c0_i32_0 : i32, i32
  }
  func.func @transform_5(%arg0: i32, %arg1: i32) -> (i32, i32) {
    %c0_i32 = arith.constant 0 : i32
    %c0_i32_0 = arith.constant 0 : i32
    return %c0_i32, %arg1 : i32, i32
  }
  func.func @transform_6(%arg0: i32, %arg1: i32) -> (i32, i32) {
    %c0_i32 = arith.constant 0 : i32
    %c0_i32_0 = arith.constant 0 : i32
    return %c0_i32, %arg1 : i32, i32
  }
  func.func @transform_7(%arg0: i32, %arg1: i32) -> (i32, i32) {
    %c0_i32 = arith.constant 0 : i32
    return %arg0, %arg1 : i32, i32
  }
}

</mosaic_0001>

<bundles_post_ra>
// kernel: roberta_lm_head.1
= control target key start
LH: loop header
LB: loop body
LE: loop exit
PB: predicated region body
PF: predicated region fallthrough
CT: control target
= control target key end

     0   :  { %v286_v0 = vmov 0.0   ;;  %vm287_vm0 = vmmov 0   ;;  %vm61_vm1 = vcmask 261120   ;;  %s368_s1 = inlined_call_operand.vmem [shape: bf16[32,32], index: 1, kind: input, shape index: {}]   ;;  %s369_s0 = inlined_call_operand.vmem [shape: bf16[16,32], index: 0, kind: input, shape index: {}]   ;;  %s370_s2 = inlined_call_operand.vmem [shape: f32[1,32], index: 2, kind: input, shape index: {}]   ;;  %s371_s5 = inlined_call_operand.vmem [shape: bf16[32,128], index: 5, kind: input, shape index: {}]   ;;  %s372_s3 = inlined_call_operand.vmem [shape: f32[1,32], index: 3, kind: input, shape index: {}]   ;;  %s373_s4 = inlined_call_operand.vmem [shape: f32[1,32], index: 4, kind: input, shape index: {}]   ;;  %s374_s6 = inlined_call_operand.vmem [shape: f32[1,128], index: 6, kind: input, shape index: {}]   ;;  %s375_s7 = inlined_call_operand.vmem [shape: f32[16,128], index: 7, kind: output, shape index: {}]  }
   0x1   :  { %255 = vmatprep.subr.bf16.mxu0 %v286_v0  ;;  %v273_v1 = vld [vmem:[%s368_s1] sm:$0xff]   ;;  %259 = vmatprep.mubr.msk.bf16.mxu0 %vm287_vm0, %v286_v0  ;;  %v274_v2 = vld [vmem:[%s368_s1 + $0x8] sm:$0xff]  }
   0x2   :  { %263 = vmatprep.subr.bf16.mxu1 %v286_v0  ;;  %267 = vmatprep.mubr.msk.bf16.mxu1 %vm287_vm0, %v286_v0  ;;  %v275_v3 = vld [vmem:[%s369_s0] sm:$0xff]   ;;  %v277_v34 = vld [vmem:[%s371_s5 + $0x8] sm:$0xff]  }
   0x3   :  { %256 = vmatpush3.bf16.msra.mxu0 %v273_v1  ;;  %v238_v4 = vld [vmem:[%s370_s2] ss:$0 sm:$0xff] }
   0x4   :  { %257 = vmatprep.subr.bf16.mxu0 %v286_v0  ;;  %v276_v33 = vld [vmem:[%s371_s5] sm:$0xff]  }
   0x5   :  { %264 = vmatpush3.bf16.msra.mxu1 %v276_v33  ;;  %v243_v43 = vld [vmem:[%s372_s3] ss:$0 sm:$0xff] }
   0x6   :  { %265 = vmatprep.subr.bf16.mxu1 %v286_v0  ;;  %v244_v47 = vld [vmem:[%s373_s4] ss:$0 sm:$0xff] }
   0x7   :  { %258 = vmatpush3.bf16.msra.mxu0 %v274_v2  ;;  %v245_v53 = vld [vmem:[%s374_s6] ss:$0 sm:$0xff] }
   0x9   :  { %266 = vmatpush3.bf16.msra.mxu1 %v277_v34 }
   0xa   :  { %260 = vmatmul.mubr.msk.bf16.vlgmr.msra.gmra.mrb[0].mxu0 %vm61_vm1, %v275_v3 }
  0xdd   :  { %v99_v5 = vpop.f32.mrb[0].mxu0 }
  0xde   :  { %v100_v6 = vadd.f32 %v238_v4, %v99_v5  ;;  %v261_v7 = vpop.f32.mrb[1].mxu0 }
  0xdf   :  { %v102_v8 = vpop.f32.mrb[2].mxu0 }
  0xe0   :  { %v108_v9 = vmul.f32 0.70710677, %v100_v6  ;;  %v103_v10 = vadd.f32 %v238_v4, %v102_v8  ;;  %v262_v11 = vpop.f32.mrb[3].mxu0  ;;  %v106_v14 = vmul.f32 0.5, %v100_v6 }
  0xe2   :  { %278 = verf.f32 %v108_v9  ;;  %v109_v12 = vmul.f32 0.70710677, %v103_v10  ;;  %v107_v17 = vmul.f32 0.5, %v103_v10 }
  0xe4   :  { %280 = verf.f32 %v109_v12 }
  0xec   :  { %v279_v13 = vpop.eup %278 }
  0xed   :  { %v112_v15 = vadd.f32 1.0, %v279_v13 }
  0xee   :  { %v281_v16 = vpop.eup %280 }
  0xef   :  { %v114_v18 = vmul.f32 %v112_v15, %v106_v14  ;;  %v113_v19 = vadd.f32 1.0, %v281_v16 }
  0xf1   :  { %v116_v20 = vsel %vm61_vm1, %v114_v18, 0.0  ;;  %v115_v21 = vmul.f32 %v113_v19, %v107_v17 }
  0xf2   :  { %117 = vadd.xlane.f32.xlu0 %v116_v20 }
  0xf3   :  { %v119_v22 = vsel %vm61_vm1, %v115_v21, 0.0 }
  0xf6   :  { %120 = vadd.xlane.f32.xlu0 %v119_v22 }
 0x17f   :  { %v118_v23 = vpop.xlane.xlu0 %117 }
 0x180   :  { %v123_v24 = vmul.f32 0.03125, %v118_v23 }
 0x182   :  { %v125_v25 = vsub.f32 %v114_v18, %v123_v24 }
 0x183   :  { %v121_v26 = vpop.xlane.xlu0 %120 }
 0x184   :  { %v124_v27 = vmul.f32 0.03125, %v121_v26  ;;  %v127_v28 = vmul.f32 %v125_v25, %v125_v25 }
 0x186   :  { %v126_v29 = vsub.f32 %v115_v21, %v124_v27  ;;  %v129_v30 = vsel %vm61_vm1, %v127_v28, 0.0 }
 0x187   :  { %130 = vadd.xlane.f32.xlu1 %v129_v30 }
 0x188   :  { %v128_v31 = vmul.f32 %v126_v29, %v126_v29 }
 0x18a   :  { %v132_v32 = vsel %vm61_vm1, %v128_v31, 0.0 }
 0x18b   :  { %133 = vadd.xlane.f32.xlu1 %v132_v32 }
 0x214   :  { %v131_v35 = vpop.xlane.xlu1 %130 }
 0x215   :  { %v135_v36 = vmul.f32 0.03125, %v131_v35 }
 0x217   :  { %v137_v37 = vadd.f32 1e-05, %v135_v36 }
 0x218   :  { %v134_v38 = vpop.xlane.xlu1 %133 }
 0x219   :  { %282 = vrsqrt.f32 %v137_v37  ;;  %v136_v39 = vmul.f32 0.03125, %v134_v38 }
 0x21b   :  { %v138_v40 = vadd.f32 1e-05, %v136_v39 }
 0x21d   :  { %284 = vrsqrt.f32 %v138_v40 }
 0x223   :  { %v283_v41 = vpop.eup %282 }
 0x224   :  { %v141_v42 = vmul.f32 %v283_v41, %v125_v25 }
 0x226   :  { %v150_v45 = vmul.f32 %v243_v43, %v141_v42 }
 0x227   :  { %v285_v44 = vpop.eup %284 }
 0x228   :  { %v142_v46 = vmul.f32 %v285_v44, %v126_v29  ;;  %v159_v49 = vadd.f32 %v244_v47, %v150_v45 }
 0x22a   :  { %v151_v48 = vmul.f32 %v243_v43, %v142_v46 }
 0x22c   :  { %v160_v50 = vadd.f32 %v244_v47, %v151_v48 }
 0x22e   :  { %v161_v51 = vpack.c.bf16 %v160_v50, %v159_v49 }
 0x230   :  { %162 = vst.msk [vmem:[#allocation2] sm:$0xff] %vm61_vm1, %v161_v51 }
 0x237   :  { %v163_v52 = vld [vmem:[#allocation2] sm:$0xff] }
 0x238   :  { %268 = vmatmul.mubr.msk.bf16.vlgmr.msra.gmra.mrb[0].mxu1 %vm61_vm1, %v163_v52 }
 0x30b   :  { %v225_v54 = vpop.f32.mrb[0].mxu1 }
 0x30c   :  { %v226_v55 = vadd.f32 %v245_v53, %v225_v54  ;;  %v269_v56 = vpop.f32.mrb[1].mxu1 }
 0x30d   :  { %v228_v57 = vpop.f32.mrb[2].mxu1 }
 0x30e   :  { %232 = vst [vmem:[%s375_s7] sm:$0xff] %v226_v55  ;;  %v229_v58 = vadd.f32 %v245_v53, %v228_v57  ;;  %v270_v59 = vpop.f32.mrb[3].mxu1 }
 0x310   :  { %233 = vst [vmem:[%s375_s7 + $0x8] sm:$0xff] %v229_v58 }

</bundles_post_ra>
